<compile_context>
chip_gen: v7x
topology: tpu7x:2x2x1
jax: 0.10.0
libtpu: 0.0.40
codegen_flags: <defaults>
</compile_context>

<pallas_src>
import jax
import jax.numpy as jnp
from jax import lax
from jax.experimental import pallas as pl
from jax.experimental.pallas import tpu as pltpu

N_NODES = 34          # karate club graph has 34 nodes
HIDDEN = 64
N_CLASSES = 2
LANE = 128            # lane-dense output slab width


def gcn_kernel(p_ref, w1_ref, b1_ref, w2_ref, b2_ref, o_ref):
    """One graph per grid step.

    p_ref : [1, N, N]    bf16  normalized propagator (== P @ X, since X = I)
    w1_ref: [N, H]       bf16  gcn1 weight (pre-transposed)
    b1_ref: [1, H]       f32
    w2_ref: [H, C]       bf16  gcn2 weight (pre-transposed)
    b2_ref: [1, C]       f32
    o_ref : [1, N, LANE] f32   lane-dense log-softmax slab (class c in lane c)
    """
    p = p_ref[0]                                               # [N, N] bf16

    # layer 1: relu((P @ X) @ W1 + b1); X = identity so P @ X == P (folded).
    h1 = jnp.dot(p, w1_ref[...], preferred_element_type=jnp.float32)
    h1 = jnp.maximum(h1 + b1_ref[...], 0.0)                    # [N, H] f32

    # layer 2: relu((P @ h1) @ W2 + b2); bf16 MXU operands, f32 accumulate.
    ph1 = jnp.dot(p, h1.astype(jnp.bfloat16),
                  preferred_element_type=jnp.float32)          # [N, H] f32
    h2 = jnp.dot(ph1.astype(jnp.bfloat16), w2_ref[...],
                 preferred_element_type=jnp.float32)
    h2 = jnp.maximum(h2 + b2_ref[...], 0.0)                    # [N, 2] f32

    # closed-form 2-class log_softmax:
    #   d = h2[:,0] - h2[:,1]; out[:,0] = d - softplus(d); out[:,1] = -softplus(d)
    d = h2[:, 0:1] - h2[:, 1:2]                                # [N, 1]
    sp = jnp.maximum(d, 0.0) + jnp.log(1.0 + jnp.exp(-jnp.abs(d)))  # softplus(d)

    col = lax.broadcasted_iota(jnp.int32, (1, LANE), 1)
    out = jnp.where(col == 0, d - sp, -sp)                     # [N, LANE], lane-dense
    o_ref[0] = out.astype(o_ref.dtype)


def gcn_forward_batched(propagators, w1, b1, w2, b2):
    """propagators: [B, N, N]. Node features are the identity (as in the
    reference module), so P @ X == P is folded and X is never materialized.
    w1: [N, H], b1: [1, H], w2: [H, C], b2: [1, C]  ->  log-probs [B, N, C]."""
    batch, n, _ = propagators.shape
    h = w1.shape[1]
    c = w2.shape[1]

    p_bf16 = propagators.astype(jnp.bfloat16)
    w1_bf16 = w1.astype(jnp.bfloat16)
    w2_bf16 = w2.astype(jnp.bfloat16)
    b1_f32 = b1.astype(jnp.float32).reshape(1, h)
    b2_f32 = b2.astype(jnp.float32).reshape(1, c)

    out_slab = pl.pallas_call(
        gcn_kernel,
        out_shape=jax.ShapeDtypeStruct((batch, n, LANE), jnp.float32),
        grid_spec=pltpu.PrefetchScalarGridSpec(
            num_scalar_prefetch=0,
            grid=(batch,),
            in_specs=[
                pl.BlockSpec((1, n, n), lambda i: (i, 0, 0)),   # per-graph propagator
                pl.BlockSpec((n, h), lambda i: (0, 0)),          # shared weights (invariant)
                pl.BlockSpec((1, h), lambda i: (0, 0)),
                pl.BlockSpec((h, c), lambda i: (0, 0)),
                pl.BlockSpec((1, c), lambda i: (0, 0)),
            ],
            out_specs=pl.BlockSpec((1, n, LANE), lambda i: (i, 0, 0)),
        ),
        compiler_params=pltpu.CompilerParams(
            dimension_semantics=("parallel",),   # shard graphs across TCs on v7x
        ),
    )(p_bf16, w1_bf16, b1_f32, w2_bf16, b2_f32)

    return out_slab[:, :, :c]                                   # [B, N, C]


def gcn_forward(propagator, w1, b1, w2, b2):
    """Single-graph convenience wrapper: propagator [N, N] -> log-probs [N, C]."""
    return gcn_forward_batched(propagator[None], w1, b1, w2, b2)[0]


def make_propagator(key, n):
    """Deterministic synthetic symmetric-normalized adjacency D^-1/2 (A+I) D^-1/2."""
    a = (jax.random.uniform(key, (n, n)) < 0.15).astype(jnp.float32)
    a = jnp.maximum(a, a.T)                      # symmetrize
    a = a * (1.0 - jnp.eye(n)) + jnp.eye(n)      # add self-loops
    d = jnp.sum(a, axis=1)
    d_inv_sqrt = 1.0 / jnp.sqrt(d)
    return a * d_inv_sqrt[:, None] * d_inv_sqrt[None, :]


def gcn_reference(p, w1, b1, w2, b2):
    """Pure-JAX f32 reference of the PyTorch module (eval mode, X = identity)."""
    x = jnp.eye(p.shape[0], dtype=jnp.float32)
    h1 = jnp.maximum((p @ x) @ w1 + b1, 0.0)
    h2 = jnp.maximum((p @ h1) @ w2 + b2, 0.0)
    return jax.nn.log_softmax(h2, axis=1)


if __name__ == "__main__":
    key = jax.random.PRNGKey(0)
    k_prop, k_w1, k_b1, k_w2, k_b2 = jax.random.split(key, 5)

    BATCH = 4
    prop_keys = jax.random.split(k_prop, BATCH)
    propagators = jnp.stack([make_propagator(k, N_NODES) for k in prop_keys])  # [B, 34, 34]

    # nn.Linear(in, out): weight [out, in], bias [out]. Pre-transpose weights
    # so the kernel does X @ W (+ b). Deterministic uniform(-1/sqrt(in), ..) init.
    bound1 = 1.0 / jnp.sqrt(jnp.float32(N_NODES))
    w1 = jax.random.uniform(k_w1, (N_NODES, HIDDEN), jnp.float32, -bound1, bound1)
    b1 = jax.random.uniform(k_b1, (1, HIDDEN), jnp.float32, -bound1, bound1)

    bound2 = 1.0 / jnp.sqrt(jnp.float32(HIDDEN))
    w2 = jax.random.uniform(k_w2, (HIDDEN, N_CLASSES), jnp.float32, -bound2, bound2)
    b2 = jax.random.uniform(k_b2, (1, N_CLASSES), jnp.float32, -bound2, bound2)

    out = gcn_forward_batched(propagators, w1, b1, w2, b2)
    jax.block_until_ready(out)
    assert out.shape == (BATCH, N_NODES, N_CLASSES)

    # sanity 1: log_softmax rows must sum to 1 in prob space
    row_sums = jnp.sum(jnp.exp(out), axis=-1)
    assert bool(jnp.all(jnp.abs(row_sums - 1.0) < 1e-3))

    # sanity 2: match the pure-JAX f32 reference (bf16 MXU operands -> loose tol)
    ref = jnp.stack([gcn_reference(propagators[i], w1, b1, w2, b2)
                     for i in range(BATCH)])
    max_err = float(jnp.max(jnp.abs(out - ref)))
    assert max_err < 5e-2, f"max abs err vs reference: {max_err}"

    print("KERNEL_OK")
</pallas_src>

<mosaic_0001>
module attributes {stable_mosaic.version = 11 : i64} {
  func.func @gcn_kernel(%arg0: i32, %arg1: memref<1x34x34xbf16, #tpu.memory_space<vmem>>, %arg2: memref<34x64xbf16, #tpu.memory_space<vmem>>, %arg3: memref<1x64xf32, #tpu.memory_space<vmem>>, %arg4: memref<64x2xbf16, #tpu.memory_space<vmem>>, %arg5: memref<1x2xf32, #tpu.memory_space<vmem>>, %arg6: memref<1x34x128xf32, #tpu.memory_space<vmem>>) attributes {dimension_semantics = [#tpu.dimension_semantics<parallel>], iteration_bounds = array<i64: 4>, scalar_prefetch = 0 : i64, scratch_operands = 0 : i64, tpu.core_type = #tpu.core_type<tc>, window_params = [{transform_indices = @transform_0, window_bounds = array<i64: 1, 34, 34>}, {pipeline_mode = #tpu.pipeline_mode<synchronous>, transform_indices = @transform_1, window_bounds = array<i64: 34, 64>}, {pipeline_mode = #tpu.pipeline_mode<synchronous>, transform_indices = @transform_2, window_bounds = array<i64: 1, 64>}, {pipeline_mode = #tpu.pipeline_mode<synchronous>, transform_indices = @transform_3, window_bounds = array<i64: 64, 2>}, {pipeline_mode = #tpu.pipeline_mode<synchronous>, transform_indices = @transform_4, window_bounds = array<i64: 1, 2>}, {transform_indices = @transform_5, window_bounds = array<i64: 1, 34, 128>}]} {
    %c0 = arith.constant 0 : index
    %c0_0 = arith.constant 0 : index
    %c0_1 = arith.constant 0 : index
    %0 = vector.load %arg1[%c0, %c0_0, %c0_1] : memref<1x34x34xbf16, #tpu.memory_space<vmem>>, vector<1x34x34xbf16>
    %1 = vector.shape_cast %0 : vector<1x34x34xbf16> to vector<34x34xbf16>
    %c0_2 = arith.constant 0 : index
    %c0_3 = arith.constant 0 : index
    %2 = vector.load %arg2[%c0_2, %c0_3] : memref<34x64xbf16, #tpu.memory_space<vmem>>, vector<34x64xbf16>
    %cst = arith.constant dense<0.000000e+00> : vector<34x64xf32>
    %3 = tpu.matmul %1, %2, %cst {dimension_numbers = #tpu.dot_dimension_numbers<[1], [0], [0], [1], [0, 0, 1, 1], [], []>} : vector<34x34xbf16>, vector<34x64xbf16>, vector<34x64xf32> -> vector<34x64xf32>
    %c0_4 = arith.constant 0 : index
    %c0_5 = arith.constant 0 : index
    %4 = vector.load %arg3[%c0_4, %c0_5] : memref<1x64xf32, #tpu.memory_space<vmem>>, vector<1x64xf32>
    %5 = vector.broadcast %4 : vector<1x64xf32> to vector<34x64xf32>
    %6 = arith.addf %3, %5 : vector<34x64xf32>
    %cst_6 = arith.constant 0.000000e+00 : f32
    %7 = vector.broadcast %cst_6 : f32 to vector<34x64xf32>
    %8 = arith.maximumf %6, %7 : vector<34x64xf32>
    %9 = arith.truncf %8 : vector<34x64xf32> to vector<34x64xbf16>
    %cst_7 = arith.constant dense<0.000000e+00> : vector<34x64xf32>
    %10 = tpu.matmul %1, %9, %cst_7 {dimension_numbers = #tpu.dot_dimension_numbers<[1], [0], [0], [1], [0, 0, 1, 1], [], []>} : vector<34x34xbf16>, vector<34x64xbf16>, vector<34x64xf32> -> vector<34x64xf32>
    %11 = arith.truncf %10 : vector<34x64xf32> to vector<34x64xbf16>
    %c0_8 = arith.constant 0 : index
    %c0_9 = arith.constant 0 : index
    %12 = vector.load %arg4[%c0_8, %c0_9] : memref<64x2xbf16, #tpu.memory_space<vmem>>, vector<64x2xbf16>
    %cst_10 = arith.constant dense<0.000000e+00> : vector<34x2xf32>
    %13 = tpu.matmul %11, %12, %cst_10 {dimension_numbers = #tpu.dot_dimension_numbers<[1], [0], [0], [1], [0, 0, 1, 1], [], []>} : vector<34x64xbf16>, vector<64x2xbf16>, vector<34x2xf32> -> vector<34x2xf32>
    %c0_11 = arith.constant 0 : index
    %c0_12 = arith.constant 0 : index
    %14 = vector.load %arg5[%c0_11, %c0_12] : memref<1x2xf32, #tpu.memory_space<vmem>>, vector<1x2xf32>
    %15 = vector.broadcast %14 : vector<1x2xf32> to vector<34x2xf32>
    %16 = arith.addf %13, %15 : vector<34x2xf32>
    %cst_13 = arith.constant 0.000000e+00 : f32
    %17 = vector.broadcast %cst_13 : f32 to vector<34x2xf32>
    %18 = arith.maximumf %16, %17 : vector<34x2xf32>
    %19 = vector.extract_strided_slice %18 {offsets = [0, 0], sizes = [34, 1], strides = [1, 1]} : vector<34x2xf32> to vector<34x1xf32>
    %20 = vector.extract_strided_slice %18 {offsets = [0, 1], sizes = [34, 1], strides = [1, 1]} : vector<34x2xf32> to vector<34x1xf32>
    %21 = arith.subf %19, %20 : vector<34x1xf32>
    %cst_14 = arith.constant 0.000000e+00 : f32
    %22 = vector.broadcast %cst_14 : f32 to vector<34x1xf32>
    %23 = arith.maximumf %21, %22 : vector<34x1xf32>
    %24 = math.absf %21 : vector<34x1xf32>
    %cst_15 = arith.constant 0.000000e+00 : f32
    %25 = vector.broadcast %cst_15 : f32 to vector<34x1xf32>
    %26 = arith.subf %25, %24 : vector<34x1xf32>
    %27 = math.exp %26 : vector<34x1xf32>
    %cst_16 = arith.constant 1.000000e+00 : f32
    %28 = vector.broadcast %cst_16 : f32 to vector<34x1xf32>
    %29 = arith.addf %28, %27 : vector<34x1xf32>
    %30 = math.log %29 : vector<34x1xf32>
    %31 = arith.addf %23, %30 : vector<34x1xf32>
    %32 = tpu.iota {dimensions = array<i32: 1>} : vector<1x128xi32>
    %c0_i32 = arith.constant 0 : i32
    %33 = vector.broadcast %c0_i32 : i32 to vector<1x128xi32>
    %34 = arith.cmpi eq, %32, %33 : vector<1x128xi32>
    %35 = arith.subf %21, %31 : vector<34x1xf32>
    %cst_17 = arith.constant 0.000000e+00 : f32
    %36 = vector.broadcast %cst_17 : f32 to vector<34x1xf32>
    %37 = arith.subf %36, %31 : vector<34x1xf32>
    %38 = vector.shape_cast %34 : vector<1x128xi1> to vector<1x128xi1>
    %39 = vector.broadcast %38 : vector<1x128xi1> to vector<34x128xi1>
    %40 = vector.shape_cast %35 : vector<34x1xf32> to vector<34x1xf32>
    %41 = vector.broadcast %40 : vector<34x1xf32> to vector<34x128xf32>
    %42 = vector.shape_cast %37 : vector<34x1xf32> to vector<34x1xf32>
    %43 = vector.broadcast %42 : vector<34x1xf32> to vector<34x128xf32>
    %44 = arith.select %39, %41, %43 : vector<34x128xi1>, vector<34x128xf32>
    %c0_18 = arith.constant 0 : index
    %c0_19 = arith.constant 0 : index
    %c0_20 = arith.constant 0 : index
    %45 = vector.load %arg6[%c0_18, %c0_19, %c0_20] : memref<1x34x128xf32, #tpu.memory_space<vmem>>, vector<1x34x128xf32>
    %46 = vector.shape_cast %45 : vector<1x34x128xf32> to vector<34x128xf32>
    %47 = vector.shape_cast %44 : vector<34x128xf32> to vector<1x34x128xf32>
    tpu.vector_store %arg6[%c0_18, %c0_19, %c0_20], %47 {strides = array<i32>} : memref<1x34x128xf32, #tpu.memory_space<vmem>>, vector<1x34x128xf32>,
    return
  }
  func.func @transform_0(%arg0: i32) -> (i32, i32, i32) {
    %c0_i32 = arith.constant 0 : i32
    %c0_i32_0 = arith.constant 0 : i32
    %c0_i32_1 = arith.constant 0 : i32
    return %arg0, %c0_i32, %c0_i32_0 : i32, i32, i32
  }
  func.func @transform_1(%arg0: i32) -> (i32, i32) {
    %c0_i32 = arith.constant 0 : i32
    %c0_i32_0 = arith.constant 0 : i32
    %c0_i32_1 = arith.constant 0 : i32
    return %c0_i32, %c0_i32_0 : i32, i32
  }
  func.func @transform_2(%arg0: i32) -> (i32, i32) {
    %c0_i32 = arith.constant 0 : i32
    %c0_i32_0 = arith.constant 0 : i32
    %c0_i32_1 = arith.constant 0 : i32
    return %c0_i32, %c0_i32_0 : i32, i32
  }
  func.func @transform_3(%arg0: i32) -> (i32, i32) {
    %c0_i32 = arith.constant 0 : i32
    %c0_i32_0 = arith.constant 0 : i32
    %c0_i32_1 = arith.constant 0 : i32
    return %c0_i32, %c0_i32_0 : i32, i32
  }
  func.func @transform_4(%arg0: i32) -> (i32, i32) {
    %c0_i32 = arith.constant 0 : i32
    %c0_i32_0 = arith.constant 0 : i32
    %c0_i32_1 = arith.constant 0 : i32
    return %c0_i32, %c0_i32_0 : i32, i32
  }
  func.func @transform_5(%arg0: i32) -> (i32, i32, i32) {
    %c0_i32 = arith.constant 0 : i32
    %c0_i32_0 = arith.constant 0 : i32
    %c0_i32_1 = arith.constant 0 : i32
    return %arg0, %c0_i32, %c0_i32_0 : i32, i32, i32
  }
}

</mosaic_0001>

<bundles_post_ra>
// kernel: tpu_custom_call.1
= control target key start
LH: loop header
LB: loop body
LE: loop exit
PB: predicated region body
PF: predicated region fallthrough
CT: control target
= control target key end

     0   :  { %s920_s18 = smov 0   ;;  %s1015_s0 = inlined_call_operand.vmem [shape: bf16[4,34,34], index: 0, kind: input, shape index: {}]   ;;  %s1016_s1 = inlined_call_operand.vmem [shape: bf16[34,64], index: 1, kind: input, shape index: {}]   ;;  %s1017_s2 = inlined_call_operand.vmem [shape: f32[1,64], index: 2, kind: input, shape index: {}]   ;;  %s1018_s3 = inlined_call_operand.vmem [shape: bf16[64,2], index: 3, kind: input, shape index: {}]   ;;  %s1019_s4 = inlined_call_operand.vmem [shape: f32[1,2], index: 4, kind: input, shape index: {}]   ;;  %s1020_s5 = inlined_call_operand.vmem [shape: f32[4,34,128], index: 5, kind: output, shape index: {}]  }
   0x1 LB: > { %s721_s19 = sadd.s32 4294967295, %s884_s18   ;;  %p725_p0 = scmp.ge.s32.totalorder %s884_s18, 1  ;;  %s884_s18 = sphi %s920_s18, %s15_s18  }
   0x2   : > { %p187_p1 = scmp.lt.s32.totalorder %s884_s18, 5 }
   0x4   : > { %p188_p2 = pnand %p725_p0, %p187_p1 }
   0x5   : > { %v848_v0 = vld [vmem:[%s1016_s1] sm:$0xff] (!%p188_p2)   ;;  %v886_v1 = vmov (!%p188_p2), 0.0   ;;  %v849_v2 = vld [vmem:[%s1016_s1 + $0x8] sm:$0xff] (!%p188_p2)   ;;  %v850_v3 = vld [vmem:[%s1016_s1 + $0x10] ss:$0 sps:$4 sm:$0x11] (!%p188_p2)  }
   0x6   : > { %191 = sbr.rel (%p188_p2) target bundleno = 988 (0x3dc), region = 40  ;;  %770 = vmatprep.subr.bf16.mxu0 (!%p188_p2), %v886_v1  ;;  %826 = vmatprep.subr.bf16.mxu1 (!%p188_p2), %v886_v1  ;;  %vm887_vm0 = vmmov (!%p188_p2), 0   ;;  %p215_p3 = scmp.lt.s32.totalorder (!%p188_p2), %s721_s19, 3  ;;  %vm281_vm1 = vcmask (!%p188_p2), 1040384   ;;  %vm271_vm2 = vcmask (!%p188_p2), 277504   ;;  %v854_v8 = vld [vmem:[%s1018_s3] sm:$0xff] (!%p188_p2)  }
   0x7   : > { %771 = vmatpush3.bf16.msra.mxu0 (!%p188_p2), %v848_v0  ;;  %829 = vmatpush3.bf16.msra.mxu1 (!%p188_p2), %v848_v0  ;;  %v283_v4 = vsel (!%p188_p2), %vm281_vm1, %v850_v3, 0  ;;  %v855_v9 = vld [vmem:[%s1018_s3 + $0x8] sm:$0xff] (!%p188_p2)   ;;  %v856_v10 = vld [vmem:[%s1018_s3 + $0x10] sm:$0xff] (!%p188_p2)   ;;  %v728_v11 = vld [vmem:[%s1017_s2] ss:$0 sm:$0xff] (!%p188_p2)  ;;  %vm450_vm3 = vcmask (!%p188_p2), 523264  }
   0x8   : > { %772 = vmatprep.subr.bf16.mxu0 (!%p188_p2), %v886_v1  ;;  %776 = vmatprep.mubr.msk.bf16.mxu0 (!%p188_p2), %vm887_vm0, %v886_v1  ;;  %v857_v38 = vld [vmem:[%s1018_s3 + $0x18] sm:$0xff] (!%p188_p2)   ;;  %v741_v54 = vld [vmem:[%s1019_s4] ss:$0 sm:$0xff] (!%p188_p2)  ;;  %s888_s17 = smov (!%p188_p2), 127  }
   0x9   : > { %827 = vmatprep.subr.bf16.mxu1 (!%p188_p2), %v886_v1  ;;  %784 = vmatprep.mubr.msk.bf16.mxu1 (!%p188_p2), %vm887_vm0, %v886_v1 }
   0xb   : > { %773 = vmatpush3.bf16.msra.mxu0 (!%p188_p2), %v849_v2  ;;  %830 = vmatpush3.bf16.msra.mxu1 (!%p188_p2), %v849_v2 }
   0xc   : > { %774 = vmatprep.subr.bf16.mxu0 (!%p188_p2), %v886_v1  ;;  %828 = vmatprep.subr.bf16.mxu1 (!%p188_p2), %v886_v1 }
   0xd   : > { %s1022_s19 = smov (!%p215_p3, %s721_s19), 3 }
   0xe   : > { %s832_s26 = smul.u32 20, %s1022_s19 }
   0xf   : > { %775 = vmatpush3.bf16.msra.mxu0 %v283_v4  ;;  %831 = vmatpush3.bf16.msra.mxu1 %v283_v4  ;;  %s833_s20 = smul.u32 40, %s1022_s19 }
  0x10   : > { %s219_s29 = scalar_lea.vmem %s1015_s0, %s832_s26  ;;  %788 = vmatprep.subr.bf16.mxu1 %v886_v1  ;;  %806 = vmatprep.subr.bf16.mxu0 %v886_v1 }
  0x11   : > { %v851_v5 = vld [vmem:[%s219_s29] sm:$0xff]   ;;  %v853_v6 = vld [vmem:[%s219_s29 + $0x10] ss:$0 sps:$4 sm:$0x11]   ;;  %v852_v7 = vld [vmem:[%s219_s29 + $0x8] sm:$0xff]   ;;  %s224_s23 = scalar_lea.vmem %s1020_s5, %s833_s20 }
  0x12   : > { %777 = vmatmul.mubr.msk.bf16.vlgmr.msra.gmra.mrb[0].mxu0 %vm271_vm2, %v851_v5  ;;  %785 = vmatmul.mubr.msk.bf16.vlgmr.msra.gmra.mrb[0].mxu1 %vm271_vm2, %v853_v6 }
  0x13   : > { %780 = vmatprep.mubr.msk.bf16.mxu0 %vm887_vm0, %v886_v1  ;;  %794 = vmatprep.mubr.msk.bf16.mxu1 %vm887_vm0, %v886_v1 }
  0x14   : > { %807 = vmatpush3.bf16.msra.mxu0 %v854_v8 }
  0x15   : > { %808 = vmatprep.subr.bf16.mxu0 %v886_v1 }
  0x18   : > { %809 = vmatpush3.bf16.msra.mxu0 %v855_v9 }
  0x19   : > { %810 = vmatprep.subr.bf16.mxu0 %v886_v1 }
  0x1a   : > { %781 = vmatmul.mubr.msk.bf16.gmra.mrb[4].mxu0 %vm271_vm2, %v852_v7 }
  0x1b   : > { %814 = vmatprep.mubr.msk.bf16.mxu0 %vm887_vm0, %v886_v1 }
  0x1c   : > { %811 = vmatpush3.bf16.msra.mxu0 %v856_v10 }
  0x1d   : > { %812 = vmatprep.subr.bf16.mxu0 %v886_v1 }
  0x20   : > { %813 = vmatpush3.bf16.msra.mxu0 %v857_v38 }
  0xe5   : > { %v319_v12 = vpop.f32.mrb[0].mxu0  ;;  %v335_v15 = vpop.f32.mrb[0].mxu1 }
  0xe6   : > { %v320_v13 = vadd.f32 %v728_v11, %v319_v12  ;;  %v778_v14 = vpop.f32.mrb[1].mxu0  ;;  %v786_v17 = vpop.f32.mrb[1].mxu1  ;;  %v336_v24 = vadd.f32 %v728_v11, %v335_v15 }
  0xe7   : > { %v322_v16 = vpop.f32.mrb[2].mxu0  ;;  %v338_v20 = vpop.f32.mrb[2].mxu1 }
  0xe8   : > { %v323_v18 = vadd.f32 %v728_v11, %v322_v16  ;;  %v779_v19 = vpop.f32.mrb[3].mxu0  ;;  %v787_v21 = vpop.f32.mrb[3].mxu1  ;;  %v341_v22 = vmax.f32 %v320_v13, 0.0  ;;  %v345_v30 = vmax.f32 %v336_v24, 0.0  ;;  %v889_v13 = vmov 0  }
  0xe9   : > { %846 = vset.pattern.permute.xlu1 %v889_v13  ;;  %847 = vset.pattern.permute.xlu0 %v889_v13 }
  0xea   : > { %v342_v23 = vmax.f32 %v323_v18, 0.0  ;;  %v348_v35 = vpack.c.bf16 %v345_v30, %v345_v30 }
  0xec   : > { %v346_v25 = vpack.c.bf16 %v342_v23, %v341_v22  ;;  %v350_v37 = vsel %vm281_vm1, %v348_v35, 0 }
  0xed   : > { %v327_v26 = vpop.f32.mrb[4].mxu0 }
  0xee   : > { %v328_v27 = vadd.f32 %v728_v11, %v327_v26  ;;  %v782_v28 = vpop.f32.mrb[5].mxu0  ;;  %789 = vmatpush3.bf16.msra.mxu1 %v346_v25 }
  0xef   : > { %v330_v29 = vpop.f32.mrb[6].mxu0  ;;  %790 = vmatprep.subr.bf16.mxu1 %v886_v1 }
  0xf0   : > { %v331_v31 = vadd.f32 %v728_v11, %v330_v29  ;;  %v783_v32 = vpop.f32.mrb[7].mxu0  ;;  %v343_v33 = vmax.f32 %v328_v27, 0.0 }
  0xf2   : > { %v344_v34 = vmax.f32 %v331_v31, 0.0 }
  0xf4   : > { %v347_v36 = vpack.c.bf16 %v344_v34, %v343_v33 }
  0xf6   : > { %791 = vmatpush3.bf16.msra.mxu1 %v347_v36 }
  0xf7   : > { %792 = vmatprep.subr.bf16.mxu1 %v886_v1 }
  0xfa   : > { %793 = vmatpush3.bf16.msra.mxu1 %v350_v37 }
  0xfd   : > { %795 = vmatmul.mubr.msk.bf16.vlgmr.msra.gmra.mrb[4].mxu1 %vm271_vm2, %v851_v5 }
  0xfe   : > { %798 = vmatprep.mubr.msk.bf16.mxu1 %vm887_vm0, %v886_v1 }
 0x105   : > { %799 = vmatmul.mubr.msk.bf16.gmra.mrb[8].mxu1 %vm271_vm2, %v852_v7 }
 0x106   : > { %802 = vmatprep.mubr.msk.bf16.mxu1 %vm887_vm0, %v886_v1 }
 0x10d   : > { %803 = vmatmul.mubr.msk.bf16.gmra.mrb[12].mxu1 %vm271_vm2, %v853_v6 }
 0x1d0   : > { %v386_v39 = vpop.f32.mrb[4].mxu1 }
 0x1d1   : > { %v796_v40 = vpop.f32.mrb[5].mxu1 }
 0x1d2   : > { %v389_v41 = vpop.f32.mrb[6].mxu1 }
 0x1d3   : > { %v408_v42 = vpack.c.bf16 %v389_v41, %v386_v39  ;;  %v797_v43 = vpop.f32.mrb[7].mxu1 }
 0x1d5   : > { %815 = vmatmul.mubr.msk.bf16.vlgmr.msra.gmra.mrb[8].mxu0 %vm450_vm3, %v408_v42 }
 0x1d6   : > { %818 = vmatprep.mubr.msk.bf16.mxu0 %vm887_vm0, %v886_v1 }
 0x1d8   : > { %v394_v44 = vpop.f32.mrb[8].mxu1 }
 0x1d9   : > { %v800_v45 = vpop.f32.mrb[9].mxu1 }
 0x1da   : > { %v397_v46 = vpop.f32.mrb[10].mxu1 }
 0x1db   : > { %v409_v47 = vpack.c.bf16 %v397_v46, %v394_v44  ;;  %v801_v48 = vpop.f32.mrb[11].mxu1 }
 0x1dd   : > { %819 = vmatmul.mubr.msk.bf16.gmra.mrb[12].mxu0 %vm450_vm3, %v409_v47 }
 0x1de   : > { %822 = vmatprep.mubr.msk.bf16.mxu0 %vm887_vm0, %v886_v1 }
 0x1e0   : > { %v402_v49 = vpop.f32.mrb[12].mxu1 }
 0x1e1   : > { %v410_v50 = vpack.c.bf16 %v402_v49, %v402_v49  ;;  %v804_v51 = vpop.f32.mrb[13].mxu1 }
 0x1e2   : > { %v405_v52 = vpop.f32.mrb[14].mxu1 }
 0x1e3   : > { %v805_v53 = vpop.f32.mrb[15].mxu1 }
 0x1e5   : > { %823 = vmatmul.mubr.msk.bf16.gmra.mrb[16].mxu0 %vm450_vm3, %v410_v50 }
 0x2a8   : > { %v494_v55 = vpop.f32.mrb[8].mxu0 }
 0x2a9   : > { %v495_v56 = vadd.f32 %v741_v54, %v494_v55  ;;  %v816_v57 = vpop.f32.mrb[9].mxu0 }
 0x2aa   : > { %v497_v58 = vpop.f32.mrb[10].mxu0 }
 0x2ab   : > { %v516_v59 = vmax.f32 %v495_v56, 0.0  ;;  %v498_v60 = vadd.f32 %v741_v54, %v497_v58  ;;  %v817_v61 = vpop.f32.mrb[11].mxu0 }
 0x2ad   : > { %526 = vrot.lane.b32.xlu0 %v516_v59, %s888_s17  ;;  %v517_v62 = vmax.f32 %v498_v60, 0.0 }
 0x2b0   : > { %v502_v63 = vpop.f32.mrb[12].mxu0 }
 0x2b1   : > { %v503_v0 = vadd.f32 %v741_v54, %v502_v63  ;;  %528 = vrot.lane.b32.xlu0 %v517_v62, %s888_s17  ;;  %v820_v1 = vpop.f32.mrb[13].mxu0 }
 0x2b2   : > { %v505_v2 = vpop.f32.mrb[14].mxu0 }
 0x2b3   : > { %v518_v3 = vmax.f32 %v503_v0, 0.0  ;;  %v506_v4 = vadd.f32 %v741_v54, %v505_v2  ;;  %v821_v5 = vpop.f32.mrb[15].mxu0 }
 0x2b5   : > { %530 = vrot.lane.b32.xlu1 %v518_v3, %s888_s17  ;;  %v519_v6 = vmax.f32 %v506_v4, 0.0 }
 0x2b8   : > { %v510_v7 = vpop.f32.mrb[16].mxu0 }
 0x2b9   : > { %v511_v8 = vadd.f32 %v741_v54, %v510_v7  ;;  %532 = vrot.lane.b32.xlu1 %v519_v6, %s888_s17  ;;  %v824_v9 = vpop.f32.mrb[17].mxu0 }
 0x2ba   : > { %v513_v10 = vpop.f32.mrb[18].mxu0 }
 0x2bb   : > { %v520_v11 = vmax.f32 %v511_v8, 0.0  ;;  %v825_v12 = vpop.f32.mrb[19].mxu0 }
 0x2bd   : > { %534 = vrot.lane.b32.xlu0 %v520_v11, %s888_s17 }
 0x31f   : > { %v527_v14 = vpop.permute.xlu0 %526 }
 0x320   : > { %v541_v15 = vsub.f32 %v516_v59, %v527_v14 }
 0x322   : > { %v551_v16 = vand.u32 2147483647, %v541_v15  ;;  %v546_v48 = vmax.f32 %v541_v15, 0.0 }
 0x323   : > { %v529_v17 = vpop.permute.xlu0 %528 }
 0x324   : > { %v556_v18 = vsub.f32 0.0, %v551_v16  ;;  %v542_v19 = vsub.f32 %v517_v62, %v529_v17 }
 0x326   : > { %v561_v20 = vmul.f32 1.442695, %v556_v18  ;;  %v552_v21 = vand.u32 2147483647, %v542_v19  ;;  %v547_v54 = vmax.f32 %v542_v19, 0.0 }
 0x327   : > { %v531_v22 = vpop.permute.xlu1 %530 }
 0x328   : > { %858 = vpow2.f32 %v561_v20  ;;  %v557_v23 = vsub.f32 0.0, %v552_v21  ;;  %v543_v24 = vsub.f32 %v518_v3, %v531_v22 }
 0x32a   : > { %v563_v25 = vmul.f32 1.442695, %v557_v23  ;;  %v553_v26 = vand.u32 2147483647, %v543_v24  ;;  %v548_v59 = vmax.f32 %v543_v24, 0.0 }
 0x32b   : > { %v533_v27 = vpop.permute.xlu1 %532 }
 0x32c   : > { %860 = vpow2.f32 %v563_v25  ;;  %v558_v28 = vsub.f32 0.0, %v553_v26  ;;  %v544_v29 = vsub.f32 %v519_v6, %v533_v27 }
 0x32e   : > { %v565_v30 = vmul.f32 1.442695, %v558_v28  ;;  %v554_v31 = vand.u32 2147483647, %v544_v29  ;;  %v549_v4 = vmax.f32 %v544_v29, 0.0 }
 0x32f   : > { %v535_v32 = vpop.permute.xlu0 %534 }
 0x330   : > { %862 = vpow2.f32 %v565_v30  ;;  %v559_v33 = vsub.f32 0.0, %v554_v31  ;;  %v545_v34 = vsub.f32 %v520_v11, %v535_v32 }
 0x332   : > { %v859_v35 = vpop.eup %858  ;;  %v567_v36 = vmul.f32 1.442695, %v559_v33  ;;  %v555_v37 = vand.u32 2147483647, %v545_v34  ;;  %v550_v6 = vmax.f32 %v545_v34, 0.0 }
 0x333   : > { %v571_v38 = vadd.f32 1.0, %v859_v35 }
 0x334   : > { %864 = vpow2.f32 %v567_v36  ;;  %v560_v39 = vsub.f32 0.0, %v555_v37 }
 0x335   : > { %866 = vlog2.f32 %v571_v38 }
 0x336   : > { %v861_v40 = vpop.eup %860  ;;  %v569_v41 = vmul.f32 1.442695, %v560_v39 }
 0x337   : > { %v572_v42 = vadd.f32 1.0, %v861_v40 }
 0x338   : > { %868 = vpow2.f32 %v569_v41 }
 0x339   : > { %870 = vlog2.f32 %v572_v42 }
 0x33a   : > { %v863_v43 = vpop.eup %862 }
 0x33b   : > { %v573_v44 = vadd.f32 1.0, %v863_v43 }
 0x33d   : > { %872 = vlog2.f32 %v573_v44 }
 0x33e   : > { %v865_v45 = vpop.eup %864 }
 0x33f   : > { %v867_v46 = vpop.eup %866  ;;  %v574_v47 = vadd.f32 1.0, %v865_v45 }
 0x340   : > { %v577_v49 = vmul.f32 0.6931472, %v867_v46 }
 0x341   : > { %874 = vlog2.f32 %v574_v47 }
 0x342   : > { %v869_v50 = vpop.eup %868  ;;  %v586_v51 = vadd.f32 %v577_v49, %v546_v48 }
 0x343   : > { %v871_v52 = vpop.eup %870  ;;  %v575_v53 = vadd.f32 1.0, %v869_v50 }
 0x344   : > { %v594_v55 = vsub.f32 %v541_v15, %v586_v51  ;;  %v579_v56 = vmul.f32 0.6931472, %v871_v52  ;;  %v599_v60 = vsub.f32 0.0, %v586_v51  ;;  %v591_v15 = vlaneseq }
 0x345   : > { %876 = vlog2.f32 %v575_v53 }
 0x346   : > { %608 = vperm.xlu1 %846, %v594_v55   ;;  %v587_v57 = vadd.f32 %v579_v56, %v547_v54  ;;  %v592_v16 = vand.u32 127, %v591_v15 }
 0x347   : > { %v873_v58 = vpop.eup %872 }
 0x348   : > { %v595_v61 = vsub.f32 %v542_v19, %v587_v57  ;;  %v581_v62 = vmul.f32 0.6931472, %v873_v58  ;;  %v600_v2 = vsub.f32 0.0, %v587_v57  ;;  %vm593_vm4 = vcmp.eq.s32.totalorder %v592_v16, 0 }
 0x34a   : > { %633 = vperm.xlu1 %846, %v599_v60   ;;  %613 = vperm.xlu0 %847, %v595_v61   ;;  %v588_v63 = vadd.f32 %v581_v62, %v548_v59 }
 0x34b   : > { %v875_v0 = vpop.eup %874 }
 0x34c   : > { %v596_v1 = vsub.f32 %v543_v24, %v588_v63  ;;  %v583_v3 = vmul.f32 0.6931472, %v875_v0  ;;  %v601_v7 = vsub.f32 0.0, %v588_v63 }
 0x34e   : > { %618 = vperm.xlu1 %846, %v596_v1   ;;  %638 = vperm.xlu0 %847, %v600_v2   ;;  %v589_v8 = vadd.f32 %v583_v3, %v549_v4 }
 0x34f   : > { %v877_v5 = vpop.eup %876 }
 0x350   : > { %v585_v9 = vmul.f32 0.6931472, %v877_v5  ;;  %v597_v11 = vsub.f32 %v544_v29, %v589_v8  ;;  %v602_v14 = vsub.f32 0.0, %v589_v8 }
 0x352   : > { %643 = vperm.xlu1 %846, %v601_v7   ;;  %v590_v10 = vadd.f32 %v585_v9, %v550_v6 }
 0x354   : > { %v598_v12 = vsub.f32 %v545_v34, %v590_v10  ;;  %v603_v13 = vsub.f32 0.0, %v590_v10 }
 0x356   : > { %623 = vperm.xlu1 %846, %v597_v11   ;;  %628 = vperm.xlu0 %847, %v598_v12  }
 0x35a   : > { %653 = vperm.xlu1 %846, %v603_v13   ;;  %648 = vperm.xlu0 %847, %v602_v14  }
 0x3c5   : > { %v609_v17 = vpop.permute.xlu1 %608 }
 0x3c9   : > { %v634_v18 = vpop.permute.xlu1 %633  ;;  %v614_v19 = vpop.permute.xlu0 %613 }
 0x3ca   : > { %v656_v20 = vsel %vm593_vm4, %v609_v17, %v634_v18 }
 0x3cb   : > { %661 = vst [vmem:[%s224_s23] sm:$0xff] %v656_v20 }
 0x3cd   : > { %v619_v21 = vpop.permute.xlu1 %618  ;;  %v639_v22 = vpop.permute.xlu0 %638 }
 0x3ce   : > { %v657_v23 = vsel %vm593_vm4, %v614_v19, %v639_v22 }
 0x3cf   : > { %662 = vst [vmem:[%s224_s23 + $0x8] sm:$0xff] %v657_v23 }
 0x3d1   : > { %v644_v24 = vpop.permute.xlu1 %643 }
 0x3d2   : > { %v658_v25 = vsel %vm593_vm4, %v619_v21, %v644_v24 }
 0x3d3   : > { %663 = vst [vmem:[%s224_s23 + $0x10] sm:$0xff] %v658_v25 }
 0x3d5   : > { %v624_v26 = vpop.permute.xlu1 %623  ;;  %v629_v27 = vpop.permute.xlu0 %628 }
 0x3d9   : > { %v654_v28 = vpop.permute.xlu1 %653  ;;  %v649_v29 = vpop.permute.xlu0 %648 }
 0x3da   : > { %v660_v30 = vsel %vm593_vm4, %v629_v27, %v654_v28  ;;  %v659_v31 = vsel %vm593_vm4, %v624_v26, %v649_v29 }
 0x3db   : > { %665 = vst [vmem:[%s224_s23 + $0x20] sm:$0x3] %v660_v30  ;;  %664 = vst [vmem:[%s224_s23 + $0x18] sm:$0xff] %v659_v31 }
 0x3dc PF: > { %s15_s18 = sadd.s32 1, %s884_s18  }
 0x3dd   : > { %p12_p4 = scmp.ge.s32.totalorder %s15_s18, 6  }
 0x3df   :  { %14 = sbr.rel (!%p12_p4) target bundleno = 1 (0x1), region = 70 }

</bundles_post_ra>
